<compile_context>
chip_gen: v7x
topology: tpu7x:2x2x1
jax: 0.10.0
libtpu: 0.0.40
codegen_flags: <defaults>
</compile_context>

<pallas_src>
import jax
import jax.numpy as jnp
from jax.experimental import pallas as pl
from jax.experimental.pallas import tpu as pltpu

LANE = 128
# ~2 MiB per block buffer: 2 inputs-bufs + 2 output-bufs = 8 MiB total,
# safely inside the scoped-VMEM default on v5e (16 MiB) / v6e / v7x (32 MiB).
TARGET_BLOCK_BYTES = 2 * 1024 * 1024


def _mish_kernel(x_ref, o_ref):
    x = x_ref[...].astype(jnp.float32)
    # tanh(softplus(x)) = (e^{2x} + 2 e^x) / (e^{2x} + 2 e^x + 2)
    # Rewritten with t = exp(-|x|) (never overflows, single EUP exp):
    #   x >= 0: (1 + 2t)   / (1 + 2t + 2t^2)
    #   x <  0: (t^2 + 2t) / (t^2 + 2t + 2)
    t = jnp.exp(-jnp.abs(x))
    two_t = 2.0 * t
    tt = t * t
    pos = x >= 0.0
    num = jnp.where(pos, 1.0 + two_t, tt + two_t)
    den = num + jnp.where(pos, 2.0 * tt, 2.0)
    # Exact divide: approx reciprocal's ULP error is not worth risking the
    # 1e-5 tolerance; the big EUP win was already removing log1p + tanh.
    y = x * (num / den)
    o_ref[...] = y.astype(o_ref.dtype)


def _sublane_multiple(itemsize):
    # 8 sublanes for 32-bit, 16 for bf16, 32 for int8 packed layouts.
    return max(8, 32 // max(1, itemsize))


def _row_tile(rows, itemsize):
    sub = _sublane_multiple(itemsize)
    # Size the block by bytes (~2 MiB) to amortize the ~0.35 us per-step
    # overhead and keep DMAs long.
    tile = max(sub, TARGET_BLOCK_BYTES // (LANE * itemsize))
    tile = min(tile, rows)
    # Keep the grid length >= 2 when possible so the "parallel" axis can be
    # sharded across both TensorCores on v7x.
    if rows >= 2 * sub:
        half = -(-rows // 2)                       # cdiv(rows, 2)
        half = ((half + sub - 1) // sub) * sub     # round up to sublane multiple
        tile = min(tile, half)
    tile = max(sub, (tile // sub) * sub)
    return tile


def mish(x):
    """Apply Mish elementwise to an arbitrary-shape array via a Pallas kernel."""
    orig_shape = x.shape
    orig_dtype = x.dtype
    n = x.size
    itemsize = jnp.dtype(orig_dtype).itemsize
    sub = _sublane_multiple(itemsize)
    align = sub * LANE

    flat = jnp.ravel(x)
    pad = (-n) % align  # fast path (no pad / no slice) when already aligned
    if pad:
        flat = jnp.pad(flat, (0, pad))
    rows = (n + pad) // LANE
    x2d = flat.reshape(rows, LANE)

    tile = _row_tile(rows, itemsize)
    grid = (pl.cdiv(rows, tile),)  # Pallas handles the ragged last block

    out2d = pl.pallas_call(
        _mish_kernel,
        out_shape=jax.ShapeDtypeStruct((rows, LANE), orig_dtype),
        grid_spec=pltpu.PrefetchScalarGridSpec(
            num_scalar_prefetch=0,
            grid=grid,
            in_specs=[pl.BlockSpec((tile, LANE), lambda i: (i, 0))],
            out_specs=pl.BlockSpec((tile, LANE), lambda i: (i, 0)),
        ),
        compiler_params=pltpu.CompilerParams(
            dimension_semantics=("parallel",),
        ),
    )(x2d)

    out_flat = out2d.reshape(-1)
    if pad:
        out_flat = out_flat[:n]
    return out_flat.reshape(orig_shape)


def mish_ref(x):
    xf = x.astype(jnp.float32)
    return (xf * jnp.tanh(jax.nn.softplus(xf))).astype(x.dtype)


if __name__ == "__main__":
    key = jax.random.PRNGKey(0)
    # NCHW input like a conv feature map: batch=2, channels=4, spatial=16x16
    x = jax.random.normal(key, (2, 4, 16, 16), dtype=jnp.float32) * 3.0

    y = mish(x)
    y = jax.block_until_ready(y)

    y_ref = mish_ref(x)
    assert y.shape == x.shape and y.dtype == x.dtype
    assert jnp.allclose(y, y_ref, atol=1e-5, rtol=1e-5), "mismatch vs reference"

    print("KERNEL_OK")
</pallas_src>

<mosaic_0001>
module attributes {stable_mosaic.version = 11 : i64} {
  func.func @_mish_kernel(%arg0: i32, %arg1: memref<8x128xf32, #tpu.memory_space<vmem>>, %arg2: memref<8x128xf32, #tpu.memory_space<vmem>>) attributes {dimension_semantics = [#tpu.dimension_semantics<parallel>], iteration_bounds = array<i64: 2>, scalar_prefetch = 0 : i64, scratch_operands = 0 : i64, tpu.core_type = #tpu.core_type<tc>, window_params = [{transform_indices = @transform_0, window_bounds = array<i64: 8, 128>}, {transform_indices = @transform_1, window_bounds = array<i64: 8, 128>}]} {
    %c0 = arith.constant 0 : index
    %c0_0 = arith.constant 0 : index
    %0 = vector.load %arg1[%c0, %c0_0] : memref<8x128xf32, #tpu.memory_space<vmem>>, vector<8x128xf32>
    %1 = math.absf %0 : vector<8x128xf32>
    %cst = arith.constant 0.000000e+00 : f32
    %2 = vector.broadcast %cst : f32 to vector<8x128xf32>
    %3 = arith.subf %2, %1 : vector<8x128xf32>
    %4 = math.exp %3 : vector<8x128xf32>
    %cst_1 = arith.constant 2.000000e+00 : f32
    %5 = vector.broadcast %cst_1 : f32 to vector<8x128xf32>
    %6 = arith.mulf %5, %4 : vector<8x128xf32>
    %7 = arith.mulf %4, %4 : vector<8x128xf32>
    %cst_2 = arith.constant 0.000000e+00 : f32
    %8 = vector.broadcast %cst_2 : f32 to vector<8x128xf32>
    %9 = arith.cmpf oge, %0, %8 : vector<8x128xf32>
    %cst_3 = arith.constant 1.000000e+00 : f32
    %10 = vector.broadcast %cst_3 : f32 to vector<8x128xf32>
    %11 = arith.addf %10, %6 : vector<8x128xf32>
    %12 = arith.addf %7, %6 : vector<8x128xf32>
    %13 = arith.select %9, %11, %12 : vector<8x128xi1>, vector<8x128xf32>
    %cst_4 = arith.constant 2.000000e+00 : f32
    %14 = vector.broadcast %cst_4 : f32 to vector<8x128xf32>
    %15 = arith.mulf %14, %7 : vector<8x128xf32>
    %cst_5 = arith.constant 2.000000e+00 : f32
    %16 = vector.broadcast %cst_5 : f32 to vector<8x128xf32>
    %17 = arith.select %9, %15, %16 : vector<8x128xi1>, vector<8x128xf32>
    %18 = arith.addf %13, %17 : vector<8x128xf32>
    %19 = arith.divf %13, %18 : vector<8x128xf32>
    %20 = arith.mulf %0, %19 : vector<8x128xf32>
    %c0_6 = arith.constant 0 : index
    %c0_7 = arith.constant 0 : index
    %21 = vector.load %arg2[%c0_6, %c0_7] : memref<8x128xf32, #tpu.memory_space<vmem>>, vector<8x128xf32>
    tpu.vector_store %arg2[%c0_6, %c0_7], %20 {strides = array<i32>} : memref<8x128xf32, #tpu.memory_space<vmem>>, vector<8x128xf32>,
    return
  }
  func.func @transform_0(%arg0: i32) -> (i32, i32) {
    %c0_i32 = arith.constant 0 : i32
    %c0_i32_0 = arith.constant 0 : i32
    return %arg0, %c0_i32 : i32, i32
  }
  func.func @transform_1(%arg0: i32) -> (i32, i32) {
    %c0_i32 = arith.constant 0 : i32
    %c0_i32_0 = arith.constant 0 : i32
    return %arg0, %c0_i32 : i32, i32
  }
}

</mosaic_0001>

<bundles_post_ra>
// kernel: tpu_custom_call.1
= control target key start
LH: loop header
LB: loop body
LE: loop exit
PB: predicated region body
PF: predicated region fallthrough
CT: control target
= control target key end

     0   :  { %6 = vsyncpa [#allocation3], 0  ;;  %s567_s0 = inlined_call_operand.hbm [shape: f32[16,128], index: 0, kind: input, shape index: {}]   ;;  %s568_s1 = inlined_call_operand.hbm [shape: f32[16,128], index: 1, kind: output, shape index: {}]  }
   0x1   :  { %8 = vsyncpa [#allocation3 + $0x1], 0 }
   0x2   :  { %9 = vsyncpa [#allocation4], 0 }
   0x3   :  { %11 = vsyncpa [#allocation4 + $0x1], 0  ;;  %s406_s6 = smov 0   ;;  %s408_s7 = smov 0  }
   0x4   :  { %s410_s8 = smov 0   ;;  %s412_s9 = smov 0  }
   0x5 LB: > { %s427_s10 = sadd.s32 4294967295, %s392_s9   ;;  %s234_s11 = sadd.s32 4294967294, %s392_s9   ;;  %s392_s9 = sphi %s412_s9, %s583_s9   ;;  %s388_s8 = sphi %s410_s8, %s582_s8   ;;  %s384_s7 = sphi %s408_s7, %s581_s7   ;;  %s380_s6 = sphi %s406_s6, %s580_s6  }
   0x6   : > { %s431_s12 = sadd.s32 1, %s392_s9   ;;  %s24_s13 = sadd.s32 1, %s388_s8 }
   0x7   : > { %s21_s14 = ssub.s32 %s392_s9, %s431_s12  ;;  %p31_p0 = scmp.ne.s32.totalorder %s388_s8, %s384_s7 }
   0x8   : > { %p22_p1 = scmp.eq.s32.totalorder %s21_s14, 0  ;;  %p32_p2 = scmp.eq.s32.totalorder %s392_s9, 0 }
   0x9   : > { %p37_p3 = scmp.ne.s32.totalorder %s384_s7, %s380_s6  ;;  %p38_p4 = scmp.eq.s32.totalorder %s427_s10, 0 }
   0xa   : > { %s443_s15 = scalar_select %p22_p1, %s388_s8, %s24_s13  }
   0xb   : > { %p445_p5 = por %p32_p2, %p31_p0  ;;  %p449_p6 = por %p38_p4, %p37_p3 }
   0xc   : > { %p61_p7 = scmp.eq.s32.totalorder %s427_s10, 1  ;;  %p67_p8 = scmp.eq.s32.totalorder %s234_s11, 1 }
   0xd   : > { %p258_p10 = scmp.lt.s32.totalorder %s392_s9, 2  ;;  %s87_s20 = sand.u32 1, %s388_s8  }
   0xe   : > { %p456_p11 = por %p61_p7, %p31_p0  ;;  %p460_p12 = por %p67_p8, %p37_p3 }
   0xf   : > { %s238_s21 = sshll.u32 %s392_s9, 7  ;;  %s237_s22 = sshll.u32 %s87_s20, 3 }
  0x10   : > { %s572_s18 = scalar_select %p456_p11, 1, 0 }
  0x11   : > { %s573_s19 = scalar_select %p460_p12, 1, 0 }
  0x12   : > { %s469_s25 = scalar_lea.hbm %s567_s0, %s238_s21  ;;  %s91_s26 = scalar_lea.vmem [#allocation2], %s237_s22 }
  0x13   : > { %s98_s27 = sshll.u32 %s91_s26, 4  ;;  %p473_p13 = pnand %p258_p10, %p445_p5  ;;  %s477_s27 = int_to_ptr.vmem [resolvable:$true] %s98_s27 }
  0x14   : > { %s88_s29 = scalar_lea.sflag [#allocation3], %s87_s20  ;;  %s296_s30 = scalar_lea.hbm %s469_s25, 128 }
  0x15   : > { %p297_p2 = scmp.ne.s32.totalorder %s469_s25, %s296_s30  ;;  %p298_p3 = pneg %p473_p13 }
  0x16   : > { %s301_s4 = scalar_lea.hbm %s567_s0, 256  ;;  %p302_p5 = scmp.lt.u32.totalorder %s469_s25, %s567_s0 }
  0x17   : > { %p299_p4 = pnand %p298_p3, %p297_p2  ;;  %p303_p8 = scmp.lt.u32.totalorder %s301_s4, %s296_s30 }
  0x18   : > { %p305_p9 = scmp.lt.u32.totalorder %s296_s30, %s469_s25 }
  0x19   : > { %p300_p7 = pneg %p299_p4  ;;  %p304_p10 = por %p303_p8, %p302_p5 }
  0x1b   : > { %p306_p0 = por %p305_p9, %p304_p10 }
  0x1d   : > { %p307_p1 = pnand %p306_p0, %p300_p7 }
  0x1f   : > { %310 = shalt.err (!%p307_p1)
}
  0x20   : > { %s311_s13 = scalar_lea.vmem %s477_s27, 128  ;;  %s394_s14 = smov [#allocation2]  }
  0x21   : > { %p312_p2 = scmp.ne.s32.totalorder %s477_s27, %s311_s13  ;;  %s316_s16 = sshll.u32 %s394_s14, 4  ;;  %s317_s16 = int_to_ptr.vmem [resolvable:$false] %s316_s16 }
  0x22   : > { %s318_s20 = scalar_lea.vmem %s317_s16, 256  ;;  %p319_p11 = scmp.lt.s32.totalorder %s477_s27, %s317_s16 }
  0x23   : > { %p314_p4 = pnand %p312_p2, %p298_p3  ;;  %p320_p5 = scmp.lt.s32.totalorder %s318_s20, %s311_s13 }
  0x25   : > { %p315_p12 = pneg %p314_p4  ;;  %p321_p8 = por %p320_p5, %p319_p11 }
  0x27   : > { %p322_p9 = pnand %p321_p8, %p315_p12 }
  0x29   : > { %325 = shalt.err (!%p322_p9)
}
  0x2a   : > { %253 = dma.hbm_to_vmem [thread:$0]  (!%p473_p13), %s469_s25, 128, %s477_s27, %s88_s29  }
  0x2b   : > { %p575_p0 = scmp.lt.s32.totalorder %s392_s9, 3  ;;  %p576_p1 = scmp.ge.s32.totalorder %s392_s9, 1 }
  0x2d   : > { %p104_p3 = pnand %p576_p1, %p575_p0 }
  0x2e   : > { %s511_s21 = sand.u32 (!%p104_p3), 1, %s384_s7  }
  0x2f   : > { %107 = sbr.rel (%p104_p3) target bundleno = 109 (0x6d), region = 24  ;;  %s240_s22 = sshll.u32 (!%p104_p3), %s511_s21, 3 }
  0x30   : > { %s110_s23 = scalar_lea.sflag (!%p104_p3), [#allocation3], %s511_s21  ;;  %s113_s24 = scalar_lea.vmem (!%p104_p3), [#allocation2], %s240_s22 }
  0x36   : > { %371 = dma.done.wait (%p449_p6), %s110_s23, 128  }
  0x37   : > { %373 = vsyncadd (%p449_p6), %s110_s23, 4294967168  ;;  %v132_v0 = vld [vmem:[%s113_s24] sm:$0xff]  ;;  %s131_s17 = scalar_lea.vmem [#allocation5], %s240_s22  ;;  %s243_s26 = sshll.u32 %s427_s10, 7 }
  0x38   : > { %v133_v1 = vand.u32 2147483647, %v132_v0  ;;  %vm139_vm0 = vcmp.ge.f32.partialorder %v132_v0, 0.0  ;;  %s164_s25 = sshll.u32 %s131_s17, 4  ;;  %s525_s29 = scalar_lea.hbm %s568_s1, %s243_s26  ;;  %s520_s25 = int_to_ptr.vmem [resolvable:$true] %s164_s25 }
  0x39   : > { %s151_s30 = scalar_lea.sflag [#allocation4], %s511_s21  ;;  %s326_s2 = scalar_lea.vmem %s520_s25, 128 }
  0x3a   : > { %v134_v2 = vsub.f32 0.0, %v133_v1  ;;  %p327_p6 = scmp.ne.s32.totalorder %s520_s25, %s326_s2  ;;  %p577_p11 = scmp.ne.s32.totalorder %s572_s18, 0 }
  0x3b   : > { %s395_s10 = smov [#allocation5]  }
  0x3c   : > { %v135_v3 = vmul.f32 1.442695, %v134_v2  ;;  %p328_p12 = pnand %p327_p6, %p577_p11  ;;  %s330_s3 = sshll.u32 %s395_s10, 4  ;;  %s331_s3 = int_to_ptr.vmem [resolvable:$false] %s330_s3 }
  0x3d   : > { %s332_s4 = scalar_lea.vmem %s331_s3, 256  ;;  %p333_p7 = scmp.lt.s32.totalorder %s520_s25, %s331_s3 }
  0x3e   : > { %292 = vpow2.f32 %v135_v3  ;;  %p329_p13 = pneg %p328_p12  ;;  %p334_p10 = scmp.lt.s32.totalorder %s332_s4, %s326_s2 }
  0x40   : > { %p335_p2 = por %p334_p10, %p333_p7 }
  0x42   : > { %p336_p4 = pnand %p335_p2, %p329_p13 }
  0x48   : > { %v293_v4 = vpop.eup %292 }
  0x49   : > { %v137_v5 = vmul.f32 2.0, %v293_v4  ;;  %v138_v6 = vmul.f32 %v293_v4, %v293_v4 }
  0x4b   : > { %v140_v7 = vadd.f32 1.0, %v137_v5  ;;  %v141_v8 = vadd.f32 %v138_v6, %v137_v5  ;;  %v143_v9 = vmul.f32 2.0, %v138_v6 }
  0x4d   : > { %v142_v10 = vsel %vm139_vm0, %v140_v7, %v141_v8  ;;  %v144_v11 = vsel %vm139_vm0, %v143_v9, 2.0 }
  0x4e   : > { %v145_v12 = vadd.f32 %v144_v11, %v142_v10 }
  0x50   : > { %294 = vrcp.f32 %v145_v12 }
  0x5a   : > { %v295_v13 = vpop.eup %294 }
  0x5b   : > { %v147_v14 = vmul.f32 %v295_v13, %v142_v10 }
  0x5d   : > { %v148_v15 = vmul.f32 %v147_v14, %v132_v0 }
  0x5f   : > { %149 = vst [vmem:[%s131_s17] sm:$0xff] %v148_v15 }
  0x60   : > { %339 = shalt.err (!%p336_p4)
}
  0x61   : > { %s340_s5 = scalar_lea.hbm %s525_s29, 128  ;;  %s344_s14 = scalar_lea.hbm %s568_s1, 256 }
  0x62   : > { %p341_p5 = scmp.ne.s32.totalorder %s525_s29, %s340_s5  ;;  %p345_p0 = scmp.lt.u32.totalorder %s525_s29, %s568_s1 }
  0x63   : > { %p346_p1 = scmp.lt.u32.totalorder %s344_s14, %s340_s5  ;;  %p348_p6 = scmp.lt.u32.totalorder %s340_s5, %s525_s29 }
  0x64   : > { %p342_p8 = pnand %p341_p5, %p577_p11 }
  0x65   : > { %p347_p3 = por %p346_p1, %p345_p0 }
  0x66   : > { %p343_p9 = pneg %p342_p8 }
  0x67   : > { %p349_p12 = por %p348_p6, %p347_p3 }
  0x69   : > { %p350_p13 = pnand %p349_p12, %p343_p9 }
  0x6b   : > { %353 = shalt.err (!%p350_p13)
}
  0x6c   : > { %248 = dma.vmem_to_hbm [thread:$0]  (%p577_p11), %s520_s25, 128, %s525_s29, %s151_s30  }
  0x6d PF: > { %s176_s21 = sand.u32 1, %s380_s6   ;;  %p578_p7 = scmp.ne.s32.totalorder %s573_s19, 0 }
  0x6e   : > { %p579_p10 = scmp.ge.s32.totalorder %s392_s9, 2  ;;  %s177_s22 = scalar_lea.sflag [#allocation4], %s176_s21 }
  0x70   : > { %p255_p2 = pnand %p579_p10, %p578_p7 }
  0x72   : > { %375 = dma.done.wait (!%p255_p2), %s177_s22, 128  }
  0x73   : > { %377 = vsyncadd (!%p255_p2), %s177_s22, 4294967168  ;;  %p14_p4 = scmp.ge.s32.totalorder %s431_s12, 4   ;;  %s580_s6 = smov %s384_s7 }
  0x74   : > { %s581_s7 = smov %s388_s8  ;;  %s582_s8 = smov %s443_s15 }
  0x75   : > { %s583_s9 = smov %s431_s12  ;;  %16 = sbr.rel (!%p14_p4) target bundleno = 5 (0x5), region = 69 }
  0x7c   :  { %182 = vsyncpa [#allocation3], 1 }
  0x7d   :  { %184 = vsyncpa [#allocation3 + $0x1], 1 }
  0x7e   :  { %185 = vsyncpa [#allocation4], 1 }
  0x7f   :  { %187 = vsyncpa [#allocation4 + $0x1], 1 }

</bundles_post_ra>
